<compile_context>
chip_gen: v7x
topology: tpu7x:2x2x1
jax: 0.10.0
libtpu: 0.0.40
codegen_flags: <defaults>
</compile_context>

<pallas_src>
import math
import functools

import jax
import jax.numpy as jnp
from jax import lax
from jax.experimental import pallas as pl
from jax.experimental.pallas import tpu as pltpu


def _self_attention_kernel(x_ref, mask_ref, wq_ref, bq_ref, wkv_ref, bkv_ref,
                           out_ref, kv_scratch, q_scratch,
                           *, num_heads: int, head_dim: int, q_tile: int,
                           kv_chunk: int, heads_per_store: int,
                           softmax_bf16: bool):
    """Grid point (b, qi): one query tile of one batch element.

    x_ref      : [1, S, H]  bf16 full-sequence hidden states (constant over qi)
    mask_ref   : [1, 1, S]  f32 additive attention mask (0 / -10000)
    wq_ref     : [H, H]     bf16 Q weight, pre-scaled by 1/sqrt(head_dim)
    bq_ref     : [1, H]     f32  Q bias, pre-scaled
    wkv_ref    : [H, 2H]    bf16 fused K|V weight
    bkv_ref    : [1, 2H]    f32  fused K|V bias
    out_ref    : [1, tq, H] context-layer output tile
    kv_scratch : [S, 2H]    bf16 VMEM scratch holding K|V for this batch element
    q_scratch  : [tq, H]    bf16 VMEM scratch holding the projected query tile
    """
    S = x_ref.shape[1]
    H = num_heads * head_dim
    qi = pl.program_id(1)

    # --- K|V projection: once per batch element, chunked over S so only a
    # [kv_chunk, 2H] f32 intermediate is live at any time. -------------------
    @pl.when(qi == 0)
    def _():
        for s0 in range(0, S, kv_chunk):
            x_c = x_ref[0, s0:s0 + kv_chunk, :]                       # [c, H] bf16
            kv = jnp.dot(x_c, wkv_ref[...],
                         preferred_element_type=jnp.float32)          # [c, 2H] f32
            kv = kv + bkv_ref[...]
            kv_scratch[s0:s0 + kv_chunk, :] = kv.astype(jnp.bfloat16)

    # --- Q projection for this query tile only (scale folded into Wq/bq). ---
    q_start = pl.multiple_of(qi * q_tile, q_tile)
    x_q = x_ref[0, pl.ds(q_start, q_tile), :]                         # [tq, H] bf16
    q = jnp.dot(x_q, wq_ref[...], preferred_element_type=jnp.float32)
    q_scratch[...] = (q + bq_ref[...]).astype(jnp.bfloat16)           # [tq, H] bf16

    # Additive mask kept as a single [1, S] row; the VPU broadcasts it along
    # sublanes inside the add (no materialized [tq, S] broadcast).
    mask_row = mask_ref[0].astype(jnp.float32)                        # [1, S]

    # --- per-head attention; heads grouped so each output store is a
    # 128-lane-aligned (or full-width) unmasked store. ------------------------
    for h0 in range(0, num_heads, heads_per_store):
        parts = []
        for h in range(h0, h0 + heads_per_store):
            c = h * head_dim
            q_h = q_scratch[:, c:c + head_dim]                        # [tq, hd] bf16
            k_h = kv_scratch[:, c:c + head_dim]                       # [S,  hd] bf16
            v_h = kv_scratch[:, H + c:H + c + head_dim]               # [S,  hd] bf16

            # scores = (Q / sqrt(hd)) @ K^T + mask   (f32 accumulation)
            scores = lax.dot_general(q_h, k_h, (((1,), (1,)), ((), ())),
                                     preferred_element_type=jnp.float32)  # [tq, S]
            scores = scores + mask_row

            # numerically stable softmax over keys
            m = jnp.max(scores, axis=-1, keepdims=True)
            if softmax_bf16:
                # bf16 exp / elementwise (v6e/v7x EUP+VPU win); f32 row-sum.
                e = jnp.exp((scores - m).astype(jnp.bfloat16))
                denom = jnp.sum(e, axis=-1, keepdims=True, dtype=jnp.float32)
                inv = pl.reciprocal(denom, approx=True).astype(jnp.bfloat16)
                probs = e * inv                                        # bf16
            else:
                e = jnp.exp(scores - m)
                denom = jnp.sum(e, axis=-1, keepdims=True)
                probs = (e * pl.reciprocal(denom, approx=True)).astype(jnp.bfloat16)

            # dropout: module runs in eval mode -> identity
            # TODO(synk): training-mode attention dropout not implemented.
            parts.append(jnp.dot(probs, v_h,
                                 preferred_element_type=jnp.float32))  # [tq, hd] f32

        chunk = parts[0] if len(parts) == 1 else jnp.concatenate(parts, axis=-1)
        c0 = h0 * head_dim
        out_ref[0, :, c0:c0 + head_dim * heads_per_store] = chunk.astype(out_ref.dtype)


def _pick_tile(n: int, candidates) -> int:
    for cand in candidates:
        if n % cand == 0:
            return cand
    return n


def custom_bert_self_attention(hidden_states, attn_mask_additive,
                               wq, bq, wk, bk, wv, bv,
                               *, num_heads: int, q_tile=None,
                               softmax_bf16: bool = True,
                               vmem_limit_bytes=None):
    """hidden_states: [B, S, H] f32; attn_mask_additive: [B, S] f32 (0/-10000)."""
    B, S, H = hidden_states.shape
    head_dim = H // num_heads
    scale = 1.0 / math.sqrt(head_dim)

    # Fold the 1/sqrt(head_dim) score scale into the Q projection; bf16 MXU weights.
    wq_s = (wq * scale).astype(jnp.bfloat16)                            # [H, H]
    bq_s = (bq * scale).reshape(1, H).astype(jnp.float32)               # [1, H]
    w_kv = jnp.concatenate([wk, wv], axis=1).astype(jnp.bfloat16)       # [H, 2H]
    b_kv = jnp.concatenate([bk, bv], axis=0).reshape(1, 2 * H).astype(jnp.float32)

    x_bf16 = hidden_states.astype(jnp.bfloat16)                         # halve x DMA
    mask3 = attn_mask_additive.reshape(B, 1, S).astype(jnp.float32)

    if q_tile is None:
        q_tile = _pick_tile(S, (128, 256, 64, 32, 16, 8))
    assert S % q_tile == 0
    nq = S // q_tile
    kv_chunk = S if S <= 256 else _pick_tile(S, (256, 128, 64, 32, 16, 8))

    # Group heads so each output store is 128-lane aligned (or full width).
    if H <= 128:
        heads_per_store = num_heads
    else:
        hps = max(1, 128 // head_dim)
        if head_dim % 128 == 0 or num_heads % hps != 0:
            hps = 1
        heads_per_store = hps

    kernel = functools.partial(_self_attention_kernel,
                               num_heads=num_heads, head_dim=head_dim,
                               q_tile=q_tile, kv_chunk=kv_chunk,
                               heads_per_store=heads_per_store,
                               softmax_bf16=softmax_bf16)

    out_bytes = jnp.dtype(hidden_states.dtype).itemsize
    # Rough VMEM budget: x (x2 bufs, bf16) + mask + resident weights + out (x2)
    # + K|V scratch + Q scratch + f32 score-temporary headroom.
    est = (2 * S * H * 2 + 2 * S * 4
           + H * H * 2 + H * 2 * H * 2 + 3 * H * 4
           + 2 * q_tile * H * out_bytes
           + S * 2 * H * 2 + q_tile * H * 2
           + 6 * q_tile * S * 4)
    if vmem_limit_bytes is None:
        # Stay <= 64 MiB so the same setting is safe on v7x; on v5e/v6e this can
        # be raised toward 100 MiB for very long sequences.
        vmem_limit_bytes = int(max(32 * 1024 * 1024,
                                   min(64 * 1024 * 1024, 2 * est)))

    grid_spec = pltpu.PrefetchScalarGridSpec(
        num_scalar_prefetch=0,
        grid=(B, nq),
        in_specs=[
            # Full-sequence hidden states; block index constant over qi -> one
            # DMA per batch element.
            pl.BlockSpec((1, S, H), lambda b, qi: (b, 0, 0)),
            pl.BlockSpec((1, 1, S), lambda b, qi: (b, 0, 0)),        # additive mask
            # Whole-array VMEM residents (single copy, no per-step pipelining).
            pl.BlockSpec(memory_space=pltpu.MemorySpace.VMEM),       # Wq (pre-scaled)
            pl.BlockSpec(memory_space=pltpu.MemorySpace.VMEM),       # bq
            pl.BlockSpec(memory_space=pltpu.MemorySpace.VMEM),       # W_kv
            pl.BlockSpec(memory_space=pltpu.MemorySpace.VMEM),       # b_kv
        ],
        out_specs=pl.BlockSpec((1, q_tile, H), lambda b, qi: (b, qi, 0)),
        scratch_shapes=[pltpu.VMEM((S, 2 * H), jnp.bfloat16),        # K|V
                        pltpu.VMEM((q_tile, H), jnp.bfloat16)],      # Q tile
    )

    cost = pl.CostEstimate(
        flops=int(2 * B * S * H * (3 * H) + 4 * B * S * S * H),
        transcendentals=int(B * num_heads * S * S),
        bytes_accessed=int(B * S * H * 2 + B * S * H * out_bytes + B * S * 4
                           + H * 3 * H * 2 + 3 * H * 4),
    )

    return pl.pallas_call(
        kernel,
        out_shape=jax.ShapeDtypeStruct((B, S, H), hidden_states.dtype),
        grid_spec=grid_spec,
        compiler_params=pltpu.CompilerParams(
            # Batch axis shards across TensorCores; the q-tile axis must stay
            # sequential because K|V scratch is filled at qi == 0.
            dimension_semantics=("parallel", "arbitrary"),
            vmem_limit_bytes=vmem_limit_bytes,
        ),
        cost_estimate=cost,
    )(x_bf16, mask3, wq_s, bq_s, w_kv, b_kv)


def _reference(hidden_states, attn_mask_additive, wq, bq, wk, bk, wv, bv,
               *, num_heads):
    B, S, H = hidden_states.shape
    hd = H // num_heads
    q = hidden_states @ wq + bq
    k = hidden_states @ wk + bk
    v = hidden_states @ wv + bv

    def split(x):  # [B,S,H] -> [B,nh,S,hd]
        return x.reshape(B, S, num_heads, hd).transpose(0, 2, 1, 3)

    qh, kh, vh = split(q), split(k), split(v)
    scores = jnp.einsum('bhqd,bhkd->bhqk', qh, kh) / math.sqrt(hd)
    scores = scores + attn_mask_additive[:, None, None, :]
    probs = jax.nn.softmax(scores, axis=-1)
    ctx = jnp.einsum('bhqk,bhkd->bhqd', probs, vh)
    return ctx.transpose(0, 2, 1, 3).reshape(B, S, H)


if __name__ == "__main__":
    # Small config consistent with the module: hidden=32, heads=4, head_dim=8.
    B, S, H, NH = 2, 8, 32, 4

    key = jax.random.PRNGKey(0)
    k_x, k_wq, k_bq, k_wk, k_bk, k_wv, k_bv = jax.random.split(key, 7)

    hidden_states = jax.random.normal(k_x, (B, S, H), dtype=jnp.float32)

    init = 1.0 / math.sqrt(H)
    wq = jax.random.normal(k_wq, (H, H), dtype=jnp.float32) * init
    wk = jax.random.normal(k_wk, (H, H), dtype=jnp.float32) * init
    wv = jax.random.normal(k_wv, (H, H), dtype=jnp.float32) * init
    bq = jax.random.normal(k_bq, (H,), dtype=jnp.float32) * 0.02
    bk = jax.random.normal(k_bk, (H,), dtype=jnp.float32) * 0.02
    bv = jax.random.normal(k_bv, (H,), dtype=jnp.float32) * 0.02

    # HF-style attention mask: 1 = attend, 0 = masked; extended additive form.
    attn_mask_01 = jnp.array([[1, 1, 1, 1, 1, 1, 0, 0],
                              [1, 1, 1, 1, 0, 0, 0, 0]], dtype=jnp.float32)
    attn_mask_additive = (1.0 - attn_mask_01) * -10000.0   # [B, S]

    out = custom_bert_self_attention(hidden_states, attn_mask_additive,
                                     wq, bq, wk, bk, wv, bv, num_heads=NH)
    out = jax.block_until_ready(out)

    ref = _reference(hidden_states, attn_mask_additive, wq, bq, wk, bk, wv, bv,
                     num_heads=NH)
    assert out.shape == (B, S, H)
    # bf16 MXU operands + bf16 softmax tail (f32 accumulation / row-sums):
    # expect ~1e-2-level agreement vs the f32 reference.
    assert jnp.allclose(out, ref, atol=5e-2, rtol=5e-2)

    print("KERNEL_OK")
</pallas_src>

<mosaic_0001>
module attributes {stable_mosaic.version = 11 : i64} {
  func.func @_self_attention_kernel(%arg0: i32, %arg1: i32, %arg2: memref<1x8x32xbf16, #tpu.memory_space<vmem>>, %arg3: memref<1x1x8xf32, #tpu.memory_space<vmem>>, %arg4: memref<32x32xbf16, #tpu.memory_space<vmem>>, %arg5: memref<1x32xf32, #tpu.memory_space<vmem>>, %arg6: memref<32x64xbf16, #tpu.memory_space<vmem>>, %arg7: memref<1x64xf32, #tpu.memory_space<vmem>>, %arg8: memref<1x8x32xf32, #tpu.memory_space<vmem>>, %arg9: memref<8x64xbf16, #tpu.memory_space<vmem>>, %arg10: memref<8x32xbf16, #tpu.memory_space<vmem>>) attributes {dimension_semantics = [#tpu.dimension_semantics<parallel>, #tpu.dimension_semantics<arbitrary>], iteration_bounds = array<i64: 2, 1>, scalar_prefetch = 0 : i64, scratch_operands = 2 : i64, tpu.core_type = #tpu.core_type<tc>, window_params = [{transform_indices = @transform_0, window_bounds = array<i64: 1, 8, 32>}, {transform_indices = @transform_1, window_bounds = array<i64: 1, 1, 8>}, {pipeline_mode = #tpu.pipeline_mode<synchronous>, transform_indices = @transform_2, window_bounds = array<i64: 32, 32>}, {pipeline_mode = #tpu.pipeline_mode<synchronous>, transform_indices = @transform_3, window_bounds = array<i64: 1, 32>}, {pipeline_mode = #tpu.pipeline_mode<synchronous>, transform_indices = @transform_4, window_bounds = array<i64: 32, 64>}, {pipeline_mode = #tpu.pipeline_mode<synchronous>, transform_indices = @transform_5, window_bounds = array<i64: 1, 64>}, {transform_indices = @transform_6, window_bounds = array<i64: 1, 8, 32>}]} {
    %c0_i32 = arith.constant 0 : i32
    %0 = arith.cmpi eq, %arg1, %c0_i32 : i32
    %1 = arith.extui %0 : i1 to i32
    %c0_i32_0 = arith.constant 0 : i32
    %2 = arith.cmpi ne, %1, %c0_i32_0 : i32
    scf.if %2 {
      %c0_47 = arith.constant 0 : index
      %c0_48 = arith.constant 0 : index
      %c0_49 = arith.constant 0 : index
      %101 = vector.load %arg2[%c0_47, %c0_48, %c0_49] : memref<1x8x32xbf16, #tpu.memory_space<vmem>>, vector<1x8x32xbf16>
      %102 = vector.shape_cast %101 : vector<1x8x32xbf16> to vector<8x32xbf16>
      %c0_50 = arith.constant 0 : index
      %c0_51 = arith.constant 0 : index
      %103 = vector.load %arg6[%c0_50, %c0_51] : memref<32x64xbf16, #tpu.memory_space<vmem>>, vector<32x64xbf16>
      %cst_52 = arith.constant dense<0.000000e+00> : vector<8x64xf32>
      %104 = tpu.matmul %102, %103, %cst_52 {dimension_numbers = #tpu.dot_dimension_numbers<[1], [0], [0], [1], [0, 0, 1, 1], [], []>} : vector<8x32xbf16>, vector<32x64xbf16>, vector<8x64xf32> -> vector<8x64xf32>
      %c0_53 = arith.constant 0 : index
      %c0_54 = arith.constant 0 : index
      %105 = vector.load %arg7[%c0_53, %c0_54] : memref<1x64xf32, #tpu.memory_space<vmem>>, vector<1x64xf32>
      %106 = vector.broadcast %105 : vector<1x64xf32> to vector<8x64xf32>
      %107 = arith.addf %104, %106 : vector<8x64xf32>
      %108 = arith.truncf %107 : vector<8x64xf32> to vector<8x64xbf16>
      %c0_55 = arith.constant 0 : index
      %c0_56 = arith.constant 0 : index
      %109 = vector.load %arg9[%c0_55, %c0_56] : memref<8x64xbf16, #tpu.memory_space<vmem>>, vector<8x64xbf16>
      tpu.vector_store %arg9[%c0_55, %c0_56], %108 {strides = array<i32>} : memref<8x64xbf16, #tpu.memory_space<vmem>>, vector<8x64xbf16>,
    } else {
    }
    %c8_i32 = arith.constant 8 : i32
    %3 = arith.muli %arg1, %c8_i32 : i32
    %4 = tpu.assume_multiple %3, 8 : i32
    %c0 = arith.constant 0 : index
    %5 = arith.index_cast %4 : i32 to index
    %c0_1 = arith.constant 0 : index
    %6 = vector.load %arg2[%c0, %5, %c0_1] : memref<1x8x32xbf16, #tpu.memory_space<vmem>>, vector<1x8x32xbf16>
    %7 = vector.shape_cast %6 : vector<1x8x32xbf16> to vector<8x32xbf16>
    %c0_2 = arith.constant 0 : index
    %c0_3 = arith.constant 0 : index
    %8 = vector.load %arg4[%c0_2, %c0_3] : memref<32x32xbf16, #tpu.memory_space<vmem>>, vector<32x32xbf16>
    %cst = arith.constant dense<0.000000e+00> : vector<8x32xf32>
    %9 = tpu.matmul %7, %8, %cst {dimension_numbers = #tpu.dot_dimension_numbers<[1], [0], [0], [1], [0, 0, 1, 1], [], []>} : vector<8x32xbf16>, vector<32x32xbf16>, vector<8x32xf32> -> vector<8x32xf32>
    %c0_4 = arith.constant 0 : index
    %c0_5 = arith.constant 0 : index
    %10 = vector.load %arg5[%c0_4, %c0_5] : memref<1x32xf32, #tpu.memory_space<vmem>>, vector<1x32xf32>
    %11 = vector.broadcast %10 : vector<1x32xf32> to vector<8x32xf32>
    %12 = arith.addf %9, %11 : vector<8x32xf32>
    %13 = arith.truncf %12 : vector<8x32xf32> to vector<8x32xbf16>
    %c0_6 = arith.constant 0 : index
    %c0_7 = arith.constant 0 : index
    %14 = vector.load %arg10[%c0_6, %c0_7] : memref<8x32xbf16, #tpu.memory_space<vmem>>, vector<8x32xbf16>
    tpu.vector_store %arg10[%c0_6, %c0_7], %13 {strides = array<i32>} : memref<8x32xbf16, #tpu.memory_space<vmem>>, vector<8x32xbf16>,
    %c0_8 = arith.constant 0 : index
    %c0_9 = arith.constant 0 : index
    %c0_10 = arith.constant 0 : index
    %15 = vector.load %arg3[%c0_8, %c0_9, %c0_10] : memref<1x1x8xf32, #tpu.memory_space<vmem>>, vector<1x1x8xf32>
    %16 = vector.shape_cast %15 : vector<1x1x8xf32> to vector<1x8xf32>
    %c0_11 = arith.constant 0 : index
    %c0_12 = arith.constant 0 : index
    %17 = vector.load %arg10[%c0_11, %c0_12] : memref<8x32xbf16, #tpu.memory_space<vmem>>, vector<8x8xbf16>
    %c0_13 = arith.constant 0 : index
    %c0_14 = arith.constant 0 : index
    %18 = vector.load %arg9[%c0_13, %c0_14] : memref<8x64xbf16, #tpu.memory_space<vmem>>, vector<8x8xbf16>
    %c0_15 = arith.constant 0 : index
    %c32 = arith.constant 32 : index
    %19 = vector.load %arg9[%c0_15, %c32] : memref<8x64xbf16, #tpu.memory_space<vmem>>, vector<8x8xbf16>
    %cst_16 = arith.constant dense<0.000000e+00> : vector<8x8xf32>
    %20 = tpu.matmul %17, %18, %cst_16 {dimension_numbers = #tpu.dot_dimension_numbers<[1], [1], [0], [0], [0, 0, 1, 0], [], []>} : vector<8x8xbf16>, vector<8x8xbf16>, vector<8x8xf32> -> vector<8x8xf32>
    %21 = vector.broadcast %16 : vector<1x8xf32> to vector<8x8xf32>
    %22 = arith.addf %20, %21 : vector<8x8xf32>
    %cst_17 = arith.constant dense<0xFF800000> : vector<8xf32>
    %23 = vector.multi_reduction <maximumf>, %22, %cst_17 [1] : vector<8x8xf32> to vector<8xf32>
    %24 = vector.shape_cast %23 : vector<8xf32> to vector<8x1xf32>
    %25 = vector.broadcast %24 : vector<8x1xf32> to vector<8x8xf32>
    %26 = arith.subf %22, %25 : vector<8x8xf32>
    %27 = arith.truncf %26 : vector<8x8xf32> to vector<8x8xbf16>
    %28 = math.exp %27 : vector<8x8xbf16>
    %29 = arith.extf %28 : vector<8x8xbf16> to vector<8x8xf32>
    %cst_18 = arith.constant dense<0.000000e+00> : vector<8xf32>
    %30 = vector.multi_reduction <add>, %29, %cst_18 [1] : vector<8x8xf32> to vector<8xf32>
    %31 = vector.shape_cast %30 : vector<8xf32> to vector<8x1xf32>
    %32 = tpu.reciprocal %31 {approx = true} : vector<8x1xf32> -> vector<8x1xf32>
    %33 = arith.truncf %32 : vector<8x1xf32> to vector<8x1xbf16>
    %34 = vector.broadcast %33 : vector<8x1xbf16> to vector<8x8xbf16>
    %35 = arith.mulf %28, %34 : vector<8x8xbf16>
    %cst_19 = arith.constant dense<0.000000e+00> : vector<8x8xf32>
    %36 = tpu.matmul %35, %19, %cst_19 {dimension_numbers = #tpu.dot_dimension_numbers<[1], [0], [0], [1], [0, 0, 1, 1], [], []>} : vector<8x8xbf16>, vector<8x8xbf16>, vector<8x8xf32> -> vector<8x8xf32>
    %c0_20 = arith.constant 0 : index
    %c8 = arith.constant 8 : index
    %37 = vector.load %arg10[%c0_20, %c8] : memref<8x32xbf16, #tpu.memory_space<vmem>>, vector<8x8xbf16>
    %c0_21 = arith.constant 0 : index
    %c8_22 = arith.constant 8 : index
    %38 = vector.load %arg9[%c0_21, %c8_22] : memref<8x64xbf16, #tpu.memory_space<vmem>>, vector<8x8xbf16>
    %c0_23 = arith.constant 0 : index
    %c40 = arith.constant 40 : index
    %39 = vector.load %arg9[%c0_23, %c40] : memref<8x64xbf16, #tpu.memory_space<vmem>>, vector<8x8xbf16>
    %cst_24 = arith.constant dense<0.000000e+00> : vector<8x8xf32>
    %40 = tpu.matmul %37, %38, %cst_24 {dimension_numbers = #tpu.dot_dimension_numbers<[1], [1], [0], [0], [0, 0, 1, 0], [], []>} : vector<8x8xbf16>, vector<8x8xbf16>, vector<8x8xf32> -> vector<8x8xf32>
    %41 = vector.broadcast %16 : vector<1x8xf32> to vector<8x8xf32>
    %42 = arith.addf %40, %41 : vector<8x8xf32>
    %cst_25 = arith.constant dense<0xFF800000> : vector<8xf32>
    %43 = vector.multi_reduction <maximumf>, %42, %cst_25 [1] : vector<8x8xf32> to vector<8xf32>
    %44 = vector.shape_cast %43 : vector<8xf32> to vector<8x1xf32>
    %45 = vector.broadcast %44 : vector<8x1xf32> to vector<8x8xf32>
    %46 = arith.subf %42, %45 : vector<8x8xf32>
    %47 = arith.truncf %46 : vector<8x8xf32> to vector<8x8xbf16>
    %48 = math.exp %47 : vector<8x8xbf16>
    %49 = arith.extf %48 : vector<8x8xbf16> to vector<8x8xf32>
    %cst_26 = arith.constant dense<0.000000e+00> : vector<8xf32>
    %50 = vector.multi_reduction <add>, %49, %cst_26 [1] : vector<8x8xf32> to vector<8xf32>
    %51 = vector.shape_cast %50 : vector<8xf32> to vector<8x1xf32>
    %52 = tpu.reciprocal %51 {approx = true} : vector<8x1xf32> -> vector<8x1xf32>
    %53 = arith.truncf %52 : vector<8x1xf32> to vector<8x1xbf16>
    %54 = vector.broadcast %53 : vector<8x1xbf16> to vector<8x8xbf16>
    %55 = arith.mulf %48, %54 : vector<8x8xbf16>
    %cst_27 = arith.constant dense<0.000000e+00> : vector<8x8xf32>
    %56 = tpu.matmul %55, %39, %cst_27 {dimension_numbers = #tpu.dot_dimension_numbers<[1], [0], [0], [1], [0, 0, 1, 1], [], []>} : vector<8x8xbf16>, vector<8x8xbf16>, vector<8x8xf32> -> vector<8x8xf32>
    %c0_28 = arith.constant 0 : index
    %c16 = arith.constant 16 : index
    %57 = vector.load %arg10[%c0_28, %c16] : memref<8x32xbf16, #tpu.memory_space<vmem>>, vector<8x8xbf16>
    %c0_29 = arith.constant 0 : index
    %c16_30 = arith.constant 16 : index
    %58 = vector.load %arg9[%c0_29, %c16_30] : memref<8x64xbf16, #tpu.memory_space<vmem>>, vector<8x8xbf16>
    %c0_31 = arith.constant 0 : index
    %c48 = arith.constant 48 : index
    %59 = vector.load %arg9[%c0_31, %c48] : memref<8x64xbf16, #tpu.memory_space<vmem>>, vector<8x8xbf16>
    %cst_32 = arith.constant dense<0.000000e+00> : vector<8x8xf32>
    %60 = tpu.matmul %57, %58, %cst_32 {dimension_numbers = #tpu.dot_dimension_numbers<[1], [1], [0], [0], [0, 0, 1, 0], [], []>} : vector<8x8xbf16>, vector<8x8xbf16>, vector<8x8xf32> -> vector<8x8xf32>
    %61 = vector.broadcast %16 : vector<1x8xf32> to vector<8x8xf32>
    %62 = arith.addf %60, %61 : vector<8x8xf32>
    %cst_33 = arith.constant dense<0xFF800000> : vector<8xf32>
    %63 = vector.multi_reduction <maximumf>, %62, %cst_33 [1] : vector<8x8xf32> to vector<8xf32>
    %64 = vector.shape_cast %63 : vector<8xf32> to vector<8x1xf32>
    %65 = vector.broadcast %64 : vector<8x1xf32> to vector<8x8xf32>
    %66 = arith.subf %62, %65 : vector<8x8xf32>
    %67 = arith.truncf %66 : vector<8x8xf32> to vector<8x8xbf16>
    %68 = math.exp %67 : vector<8x8xbf16>
    %69 = arith.extf %68 : vector<8x8xbf16> to vector<8x8xf32>
    %cst_34 = arith.constant dense<0.000000e+00> : vector<8xf32>
    %70 = vector.multi_reduction <add>, %69, %cst_34 [1] : vector<8x8xf32> to vector<8xf32>
    %71 = vector.shape_cast %70 : vector<8xf32> to vector<8x1xf32>
    %72 = tpu.reciprocal %71 {approx = true} : vector<8x1xf32> -> vector<8x1xf32>
    %73 = arith.truncf %72 : vector<8x1xf32> to vector<8x1xbf16>
    %74 = vector.broadcast %73 : vector<8x1xbf16> to vector<8x8xbf16>
    %75 = arith.mulf %68, %74 : vector<8x8xbf16>
    %cst_35 = arith.constant dense<0.000000e+00> : vector<8x8xf32>
    %76 = tpu.matmul %75, %59, %cst_35 {dimension_numbers = #tpu.dot_dimension_numbers<[1], [0], [0], [1], [0, 0, 1, 1], [], []>} : vector<8x8xbf16>, vector<8x8xbf16>, vector<8x8xf32> -> vector<8x8xf32>
    %c0_36 = arith.constant 0 : index
    %c24 = arith.constant 24 : index
    %77 = vector.load %arg10[%c0_36, %c24] : memref<8x32xbf16, #tpu.memory_space<vmem>>, vector<8x8xbf16>
    %c0_37 = arith.constant 0 : index
    %c24_38 = arith.constant 24 : index
    %78 = vector.load %arg9[%c0_37, %c24_38] : memref<8x64xbf16, #tpu.memory_space<vmem>>, vector<8x8xbf16>
    %c0_39 = arith.constant 0 : index
    %c56 = arith.constant 56 : index
    %79 = vector.load %arg9[%c0_39, %c56] : memref<8x64xbf16, #tpu.memory_space<vmem>>, vector<8x8xbf16>
    %cst_40 = arith.constant dense<0.000000e+00> : vector<8x8xf32>
    %80 = tpu.matmul %77, %78, %cst_40 {dimension_numbers = #tpu.dot_dimension_numbers<[1], [1], [0], [0], [0, 0, 1, 0], [], []>} : vector<8x8xbf16>, vector<8x8xbf16>, vector<8x8xf32> -> vector<8x8xf32>
    %81 = vector.broadcast %16 : vector<1x8xf32> to vector<8x8xf32>
    %82 = arith.addf %80, %81 : vector<8x8xf32>
    %cst_41 = arith.constant dense<0xFF800000> : vector<8xf32>
    %83 = vector.multi_reduction <maximumf>, %82, %cst_41 [1] : vector<8x8xf32> to vector<8xf32>
    %84 = vector.shape_cast %83 : vector<8xf32> to vector<8x1xf32>
    %85 = vector.broadcast %84 : vector<8x1xf32> to vector<8x8xf32>
    %86 = arith.subf %82, %85 : vector<8x8xf32>
    %87 = arith.truncf %86 : vector<8x8xf32> to vector<8x8xbf16>
    %88 = math.exp %87 : vector<8x8xbf16>
    %89 = arith.extf %88 : vector<8x8xbf16> to vector<8x8xf32>
    %cst_42 = arith.constant dense<0.000000e+00> : vector<8xf32>
    %90 = vector.multi_reduction <add>, %89, %cst_42 [1] : vector<8x8xf32> to vector<8xf32>
    %91 = vector.shape_cast %90 : vector<8xf32> to vector<8x1xf32>
    %92 = tpu.reciprocal %91 {approx = true} : vector<8x1xf32> -> vector<8x1xf32>
    %93 = arith.truncf %92 : vector<8x1xf32> to vector<8x1xbf16>
    %94 = vector.broadcast %93 : vector<8x1xbf16> to vector<8x8xbf16>
    %95 = arith.mulf %88, %94 : vector<8x8xbf16>
    %cst_43 = arith.constant dense<0.000000e+00> : vector<8x8xf32>
    %96 = tpu.matmul %95, %79, %cst_43 {dimension_numbers = #tpu.dot_dimension_numbers<[1], [0], [0], [1], [0, 0, 1, 1], [], []>} : vector<8x8xbf16>, vector<8x8xbf16>, vector<8x8xf32> -> vector<8x8xf32>
    %97 = tpu.concatenate %36, %56, %76, %96 in 1 : vector<8x8xf32>, vector<8x8xf32>, vector<8x8xf32>, vector<8x8xf32> -> vector<8x32xf32>
    %c0_44 = arith.constant 0 : index
    %c0_45 = arith.constant 0 : index
    %c0_46 = arith.constant 0 : index
    %98 = vector.load %arg8[%c0_44, %c0_45, %c0_46] : memref<1x8x32xf32, #tpu.memory_space<vmem>>, vector<1x8x32xf32>
    %99 = vector.shape_cast %98 : vector<1x8x32xf32> to vector<8x32xf32>
    %100 = vector.shape_cast %97 : vector<8x32xf32> to vector<1x8x32xf32>
    tpu.vector_store %arg8[%c0_44, %c0_45, %c0_46], %100 {strides = array<i32>} : memref<1x8x32xf32, #tpu.memory_space<vmem>>, vector<1x8x32xf32>,
    return
  }
  func.func @transform_0(%arg0: i32, %arg1: i32) -> (i32, i32, i32) {
    %c0_i32 = arith.constant 0 : i32
    %c0_i32_0 = arith.constant 0 : i32
    %c0_i32_1 = arith.constant 0 : i32
    return %arg0, %c0_i32, %c0_i32_0 : i32, i32, i32
  }
  func.func @transform_1(%arg0: i32, %arg1: i32) -> (i32, i32, i32) {
    %c0_i32 = arith.constant 0 : i32
    %c0_i32_0 = arith.constant 0 : i32
    %c0_i32_1 = arith.constant 0 : i32
    return %arg0, %c0_i32, %c0_i32_0 : i32, i32, i32
  }
  func.func @transform_2(%arg0: i32, %arg1: i32) -> (i32, i32) {
    %c0_i32 = arith.constant 0 : i32
    %c0_i32_0 = arith.constant 0 : i32
    %c0_i32_1 = arith.constant 0 : i32
    return %c0_i32, %c0_i32_0 : i32, i32
  }
  func.func @transform_3(%arg0: i32, %arg1: i32) -> (i32, i32) {
    %c0_i32 = arith.constant 0 : i32
    %c0_i32_0 = arith.constant 0 : i32
    %c0_i32_1 = arith.constant 0 : i32
    return %c0_i32, %c0_i32_0 : i32, i32
  }
  func.func @transform_4(%arg0: i32, %arg1: i32) -> (i32, i32) {
    %c0_i32 = arith.constant 0 : i32
    %c0_i32_0 = arith.constant 0 : i32
    %c0_i32_1 = arith.constant 0 : i32
    return %c0_i32, %c0_i32_0 : i32, i32
  }
  func.func @transform_5(%arg0: i32, %arg1: i32) -> (i32, i32) {
    %c0_i32 = arith.constant 0 : i32
    %c0_i32_0 = arith.constant 0 : i32
    %c0_i32_1 = arith.constant 0 : i32
    return %c0_i32, %c0_i32_0 : i32, i32
  }
  func.func @transform_6(%arg0: i32, %arg1: i32) -> (i32, i32, i32) {
    %c0_i32 = arith.constant 0 : i32
    %c0_i32_0 = arith.constant 0 : i32
    return %arg0, %arg1, %c0_i32 : i32, i32, i32
  }
}

</mosaic_0001>

<bundles_post_ra>
// kernel: tpu_custom_call.1
= control target key start
LH: loop header
LB: loop body
LE: loop exit
PB: predicated region body
PF: predicated region fallthrough
CT: control target
= control target key end

     0   :  { %11 = vsyncpa [#allocation5], 0  ;;  %s1882_s0 = inlined_call_operand.hbm [shape: bf16[2,8,32], index: 0, kind: input, shape index: {}]   ;;  %s1883_s1 = inlined_call_operand.vmem [shape: f32[2,1,8], index: 1, kind: input, shape index: {}]   ;;  %s1884_s2 = inlined_call_operand.hbm [shape: bf16[32,32], index: 2, kind: input, shape index: {}]   ;;  %s1885_s3 = inlined_call_operand.vmem [shape: f32[1,32], index: 3, kind: input, shape index: {}]   ;;  %s1886_s4 = inlined_call_operand.hbm [shape: bf16[32,64], index: 4, kind: input, shape index: {}]   ;;  %s1887_s5 = inlined_call_operand.vmem [shape: f32[1,64], index: 5, kind: input, shape index: {}]   ;;  %s1888_s6 = inlined_call_operand.hbm [shape: f32[2,8,32], index: 6, kind: output, shape index: {}]  }
   0x1   :  { %13 = vsyncpa [#allocation5 + $0x1], 0 }
   0x2   :  { %14 = vsyncpa [#allocation8], 0 }
   0x3   :  { %15 = vsyncpa [#allocation6], 0 }
   0x4   :  { %17 = vsyncpa [#allocation6 + $0x1], 0  ;;  %s1551_s21 = smov 0   ;;  %s1553_s22 = smov 0  }
   0x5   :  { %s1555_s23 = smov 0   ;;  %s1557_s24 = smov 0  }
   0x6   :  { %s1559_s25 = smov 0   ;;  %s1561_s26 = smov 0  }
   0x7 LB: > { %s1083_s27 = sadd.s32 4294967295, %s1496_s26   ;;  %s1084_s28 = sadd.s32 4294967294, %s1496_s26   ;;  %s1496_s26 = sphi %s1561_s26, %s23_s26   ;;  %s1492_s25 = sphi %s1559_s25, %s1913_s25   ;;  %s1488_s24 = sphi %s1557_s24, %s1912_s24   ;;  %s1484_s23 = sphi %s1555_s23, %s1911_s23   ;;  %s1480_s22 = sphi %s1553_s22, %s1910_s22   ;;  %s1476_s21 = sphi %s1551_s21, %s1909_s21  }
   0x8   : > { %p55_p0 = scmp.ne.s32.totalorder %s1480_s22, %s1476_s21  ;;  %p1585_p1 = scmp.eq.s32.totalorder %s1083_s27, 0 }
   0x9   : > { %p1589_p2 = scmp.eq.s32.totalorder %s1083_s27, 1  ;;  %p197_p3 = scmp.eq.s32.totalorder %s1084_s28, 1 }
   0xa   : > { %s1894_s29 = scalar_select %p1585_p1, 1, 0 }
   0xb   : > { %p1595_p4 = por %p1585_p1, %p55_p0  ;;  %p1085_p5 = scmp.ge.s32.totalorder %s1496_s26, 1 }
   0xc   : > { %p1600_p6 = por %p197_p3, %p55_p0  ;;  %p204_p7 = scmp.lt.s32.totalorder %s1496_s26, 3 }
   0xd   : > { %s1896_s7 = scalar_select %p1595_p4, 1, 0 }
   0xe   : > { %s1897_s8 = scalar_select %p1600_p6, 1, 0 }
   0xf   : > { %p1605_p8 = pnand %p1085_p5, %p204_p7  ;;  %s1498_s10 = smov [#allocation7]  }
  0x10   : > { %1898 = sst [smem:[#allocation14_spill]] %s1897_s8  ;;  %s216_s11 = sshll.u32 %s1498_s10, 4  ;;  %s1609_s11 = int_to_ptr.vmem [resolvable:$true] %s216_s11 }
  0x11   : > { %p1217_p9 = pneg %p1605_p8  ;;  %s1499_s13 = smov [#allocation9]  }
  0x12   : > { %s232_s14 = sshll.u32 %s1499_s13, 4  ;;  %s1324_s17 = scalar_lea.hbm %s1884_s2, 256  ;;  %s1620_s14 = int_to_ptr.vmem [resolvable:$true] %s232_s14 }
  0x13   : > { %p1616_p11 = pnand %p1217_p9, %p1585_p1  ;;  %p1325_p12 = scmp.ne.s32.totalorder %s1884_s2, %s1324_s17 }
  0x14   : > { %p1331_p5 = scmp.lt.u32.totalorder %s1324_s17, %s1884_s2 }
  0x15   : > { %p1326_p13 = pneg %p1616_p11 }
  0x17   : > { %p1327_p0 = pnand %p1326_p13, %p1325_p12 }
  0x19   : > { %p1328_p3 = pneg %p1327_p0 }
  0x1b   : > { %p1333_p7 = pnand %p1331_p5, %p1328_p3 }
  0x1d   : > { %1336 = shalt.err (!%p1333_p7)
}
  0x1e   : > { %s1337_s28 = scalar_lea.vmem %s1609_s11, 256  ;;  %p1345_p1 = scmp.lt.s32.totalorder %s1609_s11, %s1609_s11 }
  0x1f   : > { %p1338_p9 = scmp.ne.s32.totalorder %s1609_s11, %s1337_s28  ;;  %p1346_p12 = scmp.lt.s32.totalorder %s1337_s28, %s1337_s28 }
  0x21   : > { %p1340_p10 = pnand %p1338_p9, %p1326_p13  ;;  %p1347_p0 = por %p1346_p12, %p1345_p1 }
  0x23   : > { %p1341_p6 = pneg %p1340_p10 }
  0x25   : > { %p1348_p4 = pnand %p1347_p0, %p1341_p6 }
  0x27   : > { %1351 = shalt.err (!%p1348_p4)
}
  0x28   : > { %s1500_s10 = smov 64   ;;  %s1501_s13 = smov 4  }
  0x29   : > { %1220 = dma.hbm_to_vmem [thread:$0]  (!%p1616_p11), %s1884_s2, 256, %s1609_s11, [#allocation8], %s1500_s10, %s1500_s10, %s1501_s13  }
  0x2a   : > { %s1352_s19 = scalar_lea.hbm %s1886_s4, 256 }
  0x2b   : > { %p1353_p1 = scmp.ne.s32.totalorder %s1886_s4, %s1352_s19  ;;  %p1359_p10 = scmp.lt.u32.totalorder %s1352_s19, %s1886_s4 }
  0x2d   : > { %p1355_p4 = pnand %p1353_p1, %p1326_p13 }
  0x2f   : > { %p1356_p6 = pneg %p1355_p4 }
  0x31   : > { %p1361_p3 = pnand %p1359_p10, %p1356_p6 }
  0x33   : > { %1364 = shalt.err (!%p1361_p3)
}
  0x34   : > { %s1365_s11 = scalar_lea.vmem %s1620_s14, 256  ;;  %p1373_p12 = scmp.lt.s32.totalorder %s1620_s14, %s1620_s14 }
  0x35   : > { %p1366_p5 = scmp.ne.s32.totalorder %s1620_s14, %s1365_s11  ;;  %p1374_p0 = scmp.lt.s32.totalorder %s1365_s11, %s1365_s11 }
  0x37   : > { %p1368_p7 = pnand %p1366_p5, %p1326_p13  ;;  %p1375_p1 = por %p1374_p0, %p1373_p12 }
  0x39   : > { %p1369_p9 = pneg %p1368_p7 }
  0x3b   : > { %p1376_p4 = pnand %p1375_p1, %p1369_p9 }
  0x3d   : > { %1379 = shalt.err (!%p1376_p4)
}
  0x3e   : > { %1223 = dma.hbm_to_vmem [thread:$0]  (!%p1616_p11), %s1886_s4, 256, %s1620_s14, [#allocation8], %s1500_s10, %s1500_s10, %s1501_s13  }
  0x3f   : > { %s35_s16 = sadd.s32 1, %s1492_s25  ;;  %s42_s17 = sadd.s32 1, %s1484_s23 }
  0x40   : > { %p37_p13 = scmp.ge.s32.totalorder %s35_s16, 2  ;;  %p49_p6 = scmp.ne.s32.totalorder %s1484_s23, %s1480_s22 }
  0x41   : > { %p50_p10 = scmp.eq.s32.totalorder %s1496_s26, 0  ;;  %p1234_p3 = scmp.lt.s32.totalorder %s1496_s26, 2 }
  0x42   : > { %s1915_s16 = smov (%p37_p13, %s35_s16), 0  ;;  %p1684_p7 = por %p1589_p2, %p49_p6 }
  0x43   : > { %p51_p5 = por %p50_p10, %p49_p6  ;;  %s39_s18 = ssub.s32 %s1492_s25, %s1915_s16 }
  0x44   : > { %s1901_s12 = scalar_select %p1684_p7, 1, 0 }
  0x45   : > { %s249_s19 = sand.u32 1, %s1484_s23   ;;  %p40_p9 = scmp.eq.s32.totalorder %s39_s18, 0 }
  0x46   : > { %s1089_s14 = sshll.u32 %s249_s19, 2  ;;  %s1090_s10 = sshll.u32 %s1492_s25, 6 }
  0x47   : > { %s1693_s13 = scalar_select %p40_p9, %s1484_s23, %s42_s17  }
  0x48   : > { %s1698_s28 = scalar_lea.hbm %s1882_s0, %s1090_s10  ;;  %s253_s30 = scalar_lea.vmem [#allocation4], %s1089_s14 }
  0x49   : > { %s260_s11 = sshll.u32 %s253_s30, 4  ;;  %p1702_p2 = pnand %p1234_p3, %p51_p5  ;;  %s1706_s11 = int_to_ptr.vmem [resolvable:$true] %s260_s11 }
  0x4a   : > { %s250_s15 = scalar_lea.sflag [#allocation5], %s249_s19  ;;  %s1380_s17 = scalar_lea.hbm %s1698_s28, 64 }
  0x4b   : > { %p1381_p11 = scmp.ne.s32.totalorder %s1698_s28, %s1380_s17  ;;  %p1382_p12 = pneg %p1702_p2 }
  0x4c   : > { %s1385_s10 = scalar_lea.hbm %s1882_s0, 128  ;;  %p1386_p4 = scmp.lt.u32.totalorder %s1698_s28, %s1882_s0 }
  0x4d   : > { %p1383_p0 = pnand %p1382_p12, %p1381_p11  ;;  %p1387_p13 = scmp.lt.u32.totalorder %s1385_s10, %s1380_s17 }
  0x4e   : > { %p1389_p10 = scmp.lt.u32.totalorder %s1380_s17, %s1698_s28 }
  0x4f   : > { %p1384_p1 = pneg %p1383_p0  ;;  %p1388_p6 = por %p1387_p13, %p1386_p4 }
  0x51   : > { %p1390_p3 = por %p1389_p10, %p1388_p6 }
  0x53   : > { %p1391_p5 = pnand %p1390_p3, %p1384_p1 }
  0x55   : > { %1394 = shalt.err (!%p1391_p5)
}
  0x56   : > { %s1395_s19 = scalar_lea.vmem %s1706_s11, 64  ;;  %s1502_s30 = smov [#allocation4]  }
  0x57   : > { %p1396_p9 = scmp.ne.s32.totalorder %s1706_s11, %s1395_s19  ;;  %s1400_s18 = sshll.u32 %s1502_s30, 4  ;;  %s1401_s18 = int_to_ptr.vmem [resolvable:$false] %s1400_s18 }
  0x58   : > { %s1402_s14 = scalar_lea.vmem %s1401_s18, 128  ;;  %p1403_p7 = scmp.lt.s32.totalorder %s1706_s11, %s1401_s18 }
  0x59   : > { %p1398_p11 = pnand %p1396_p9, %p1382_p12  ;;  %p1404_p4 = scmp.lt.s32.totalorder %s1402_s14, %s1395_s19 }
  0x5b   : > { %p1399_p0 = pneg %p1398_p11  ;;  %p1405_p13 = por %p1404_p4, %p1403_p7 }
  0x5d   : > { %p1406_p6 = pnand %p1405_p13, %p1399_p0 }
  0x5f   : > { %1409 = shalt.err (!%p1406_p6)
}
  0x60   : > { %1227 = dma.hbm_to_vmem [thread:$0]  (!%p1702_p2), %s1698_s28, 64, %s1706_s11, %s250_s15  }
  0x61   : > { %275 = sbr.rel (%p1605_p8) target bundleno = 1369 (0x559), region = 44  ;;  %s1736_s17 = sand.u32 (!%p1605_p8), 1, %s1480_s22  }
  0x62   : > { %s1092_s10 = sshll.u32 (!%p1605_p8), %s1736_s17, 2  ;;  %s278_s20 = scalar_lea.sflag (!%p1605_p8), [#allocation5], %s1736_s17 }
  0x63   : > { %s281_s27 = scalar_lea.vmem (!%p1605_p8), [#allocation4], %s1092_s10  ;;  %p1903_p7 = scmp.ne.s32.totalorder (!%p1605_p8), %s1896_s7, 0 }
  0x68   : > { %1463 = dma.done.wait (%p1903_p7), %s278_s20, 64  }
  0x69   : > { %1465 = vsyncadd (%p1903_p7), %s278_s20, 4294967232  ;;  %p1904_p12 = scmp.ne.s32.totalorder %s1894_s29, 0 }
  0x6b   : > { %1467 = dma.done.wait (%p1904_p12), [#allocation8], 512  }
  0x6c   : > { %1469 = vsyncadd (%p1904_p12), [#allocation8], 4294966784  ;;  %v1503_v0 = vmov 0.0   ;;  %vm1504_vm0 = vmmov 0   ;;  %v1302_v1 = vld [vmem:[#allocation9] sm:$0xff]   ;;  %v1303_v2 = vld [vmem:[#allocation9 + $0x8] sm:$0xff]  }
  0x6d   : > { %1141 = vmatprep.subr.bf16.mxu0 %v1503_v0  ;;  %1149 = vmatprep.subr.bf16.mxu1 %v1503_v0  ;;  %v1304_v3 = vld [vmem:[#allocation7] sm:$0xff]   ;;  %v1305_v4 = vld [vmem:[#allocation7 + $0x8] sm:$0xff]   ;;  %v329_v5 = vld [vmem:[%s281_s27] sm:$0xf]  ;;  %vm353_vm1 = vcmask 261120   ;;  %vm398_vm2 = vcmask 519168  }
  0x6e   : > { %1145 = vmatprep.mubr.msk.bf16.mxu0 %vm1504_vm0, %v1503_v0  ;;  %1153 = vmatprep.mubr.msk.bf16.mxu1 %vm1504_vm0, %v1503_v0  ;;  %v405_v6 = vld [vmem:[%s281_s27] sm:$0xf]  ;;  %v1096_v7 = vld [vmem:[%s1887_s5] ss:$0 sm:$0xff]  ;;  %vm474_vm3 = vcmask 257024   ;;  %vm485_vm4 = vcmask 64512  }
  0x6f   : > { %1142 = vmatpush3.bf16.msra.mxu0 %v1302_v1  ;;  %1150 = vmatpush3.bf16.msra.mxu1 %v1304_v3  ;;  %v1100_v9 = vld [vmem:[%s1885_s3] ss:$0 sm:$0xff]  ;;  %s1505_s11 = smov 112   ;;  %s1506_s8 = smov 120   ;;  %vm555_vm5 = vcmask 1043456   ;;  %vm954_vm6 = vcmask 130048  }
  0x70   : > { %1143 = vmatprep.subr.bf16.mxu0 %v1503_v0  ;;  %1151 = vmatprep.subr.bf16.mxu1 %v1503_v0  ;;  %s1507_s15 = smov 104   ;;  %p321_p8 = scmp.lt.s32.totalorder %s1488_s24, 1  ;;  %vm956_vm7 = vcmask 195584  }
  0x71   : > { %s1508_s10 = smov 96   ;;  %s1509_s20 = smov 80  }
  0x72   : > { %s322_s19 = scalar_select %p321_p8, %s1488_s24, 1 }
  0x73   : > { %1144 = vmatpush3.bf16.msra.mxu0 %v1303_v2  ;;  %1152 = vmatpush3.bf16.msra.mxu1 %v1305_v4  ;;  %s1510_s27 = smov 72   ;;  %s1511_s29 = smov 88  }
  0x74   : > { %1157 = vmatprep.subr.bf16.mxu0 %v1503_v0  ;;  %1163 = vmatprep.subr.bf16.mxu1 %v1503_v0  ;;  %s323_s14 = scalar_lea.vmem %s1883_s1, %s322_s19  ;;  %s1512_s7 = smov 8  }
  0x75   : > { %v1104_v35 = vld [vmem:[%s323_s14] ss:$0 sm:$0xff]  ;;  %s1513_s9 = smov 16   ;;  %s1514_s28 = smov 24  }
  0x76   : > { %1146 = vmatmul.mubr.msk.bf16.vlgmr.msra.gmra.mrb[0].mxu0 %vm353_vm1, %v329_v5  ;;  %1154 = vmatmul.mubr.msk.bf16.vlgmr.msra.gmra.mrb[0].mxu1 %vm353_vm1, %v405_v6  ;;  %p1905_p1 = scmp.ne.s32.totalorder %s1901_s12, 0 }
  0x77   : > { %1159 = vmatprep.mubr.msk.bf16.mxu0 %vm1504_vm0, %v1503_v0  ;;  %1165 = vmatprep.mubr.msk.bf16.mxu1 %vm1504_vm0, %v1503_v0 }
 0x149   : > { %v391_v8 = vpop.f32.mrb[0].mxu0  ;;  %v467_v13 = vpop.f32.mrb[0].mxu1 }
 0x14a   : > { %v392_v10 = vadd.f32 %v1096_v7, %v391_v8  ;;  %v1147_v11 = vpop.f32.mrb[1].mxu0  ;;  %v468_v16 = vadd.f32 %v1100_v9, %v467_v13  ;;  %v1155_v17 = vpop.f32.mrb[1].mxu1 }
 0x14b   : > { %v394_v12 = vpop.f32.mrb[2].mxu0  ;;  %v470_v18 = vpop.f32.mrb[2].mxu1 }
 0x14c   : > { %v397_v14 = vpack.c.bf16 %v392_v10, %v392_v10  ;;  %v1148_v15 = vpop.f32.mrb[3].mxu0  ;;  %v473_v19 = vpack.c.bf16 %v468_v16, %v468_v16  ;;  %v1156_v20 = vpop.f32.mrb[3].mxu1 }
 0x14e   : > { %399 = vst.msk [vmem:[#allocation2] sm:$0xf] %vm398_vm2, %v397_v14 }
 0x14f   : > { %475 = vst.msk [vmem:[#allocation3] sm:$0xf] %vm474_vm3, %v473_v19 }
 0x155   : > { %v478_v21 = vld [vmem:[#allocation2] sm:$0xf] }
 0x156   : > { %v490_v22 = vsel %vm485_vm4, %v478_v21, 0  ;;  %v1771_v23 = vcombine.low %v478_v21, %v478_v21  ;;  %v477_v24 = vld [vmem:[#allocation3] sm:$0xf] }
 0x157   : > { %1158 = vmatpush3.bf16.xpose.msra.mxu0 %v490_v22  ;;  %v1108_v25 = vcombine.low %v477_v24, %v477_v24 }
 0x158   : > { %717 = vrot.lane.b32.xlu1 %v1771_v23, %s1505_s11  ;;  %604 = vrot.lane.b32.xlu0 %v1771_v23, %s1506_s8 }
 0x159   : > { %1169 = vmatprep.subr.bf16.mxu0 %v1503_v0 }
 0x15c   : > { %715 = vrot.lane.b32.xlu1 %v1108_v25, %s1505_s11  ;;  %602 = vrot.lane.b32.xlu0 %v1108_v25, %s1506_s8  ;;  %s1095_s11 = sshll.u32 %s1736_s17, 3  ;;  %s1116_s8 = sshll.u32 %s1488_s24, 7 }
 0x15d   : > { %s1832_s14 = scalar_lea.hbm %s1888_s6, %s1116_s8  ;;  %s960_s24 = scalar_lea.sflag [#allocation6], %s1736_s17 }
 0x15e   : > { %1160 = vmatmul.mubr.msk.bf16.vlgmr.msra.gmra.mrb[4].mxu0 %vm485_vm4, %v477_v24 }
 0x15f   : > { %1171 = vmatprep.mubr.msk.bf16.mxu0 %vm1504_vm0, %v1503_v0 }
 0x160   : > { %828 = vrot.lane.b32.xlu1 %v1108_v25, %s1507_s15  ;;  %830 = vrot.lane.b32.xlu0 %v1771_v23, %s1507_s15  ;;  %s320_s15 = scalar_lea.vmem [#allocation10], %s1095_s11 }
 0x161   : > { %s974_s19 = sshll.u32 %s320_s15, 4  ;;  %s1834_s19 = int_to_ptr.vmem [resolvable:$true] %s974_s19 }
 0x1ca   : > { %v605_v26 = vpop.permute.xlu0 %604  ;;  %v718_v28 = vpop.permute.xlu1 %717 }
 0x1cb   : > { %v610_v27 = vsel %vm485_vm4, %v605_v26, 0  ;;  %v723_v30 = vsel %vm485_vm4, %v718_v28, 0 }
 0x1cc   : > { %1170 = vmatpush3.bf16.xpose.msra.mxu0 %v610_v27 }
 0x1cd   : > { %1181 = vmatprep.subr.bf16.mxu0 %v1503_v0 }
 0x1ce   : > { %v603_v29 = vpop.permute.xlu0 %602  ;;  %v716_v32 = vpop.permute.xlu1 %715 }
 0x1d2   : > { %v831_v31 = vpop.permute.xlu0 %830  ;;  %v829_v34 = vpop.permute.xlu1 %828 }
 0x1d3   : > { %1172 = vmatmul.mubr.msk.bf16.vlgmr.msra.gmra.mrb[8].mxu0 %vm485_vm4, %v603_v29  ;;  %v836_v33 = vsel %vm485_vm4, %v831_v31, 0 }
 0x1d4   : > { %1182 = vmatpush3.bf16.xpose.msra.mxu0 %v723_v30  ;;  %1183 = vmatprep.mubr.msk.bf16.mxu0 %vm1504_vm0, %v1503_v0 }
 0x1d5   : > { %1193 = vmatprep.subr.bf16.mxu0 %v1503_v0 }
 0x1db   : > { %1184 = vmatmul.mubr.msk.bf16.vlgmr.msra.gmra.mrb[12].mxu0 %vm485_vm4, %v716_v32 }
 0x1dc   : > { %1194 = vmatpush3.bf16.xpose.msra.mxu0 %v836_v33  ;;  %1195 = vmatprep.mubr.msk.bf16.mxu0 %vm1504_vm0, %v1503_v0 }
 0x1e3   : > { %1196 = vmatmul.mubr.msk.bf16.vlgmr.msra.gmra.mrb[16].mxu0 %vm485_vm4, %v829_v34 }
 0x231   : > { %v526_v36 = vpop.f32.mrb[4].mxu0 }
 0x232   : > { %v527_v37 = vadd.f32 %v1104_v35, %v526_v36  ;;  %v1161_v38 = vpop.f32.mrb[5].mxu0 }
 0x233   : > { %v529_v39 = vpop.f32.mrb[6].mxu0 }
 0x234   : > { %v1162_v40 = vpop.f32.mrb[7].mxu0  ;;  %v532_v41 = vsel %vm485_vm4, %v527_v37, -inf }
 0x235   : > { %533 = vmax.xlane.f32.xlu0 %v532_v41 }
 0x2a6   : > { %v646_v42 = vpop.f32.mrb[8].mxu0 }
 0x2a7   : > { %v647_v43 = vadd.f32 %v1104_v35, %v646_v42  ;;  %v1173_v44 = vpop.f32.mrb[9].mxu0 }
 0x2a8   : > { %v649_v45 = vpop.f32.mrb[10].mxu0 }
 0x2a9   : > { %v1174_v46 = vpop.f32.mrb[11].mxu0  ;;  %v652_v47 = vsel %vm485_vm4, %v647_v43, -inf }
 0x2aa   : > { %653 = vmax.xlane.f32.xlu1 %v652_v47 }
 0x2ae   : > { %v759_v48 = vpop.f32.mrb[12].mxu0 }
 0x2af   : > { %v760_v49 = vadd.f32 %v1104_v35, %v759_v48  ;;  %v1185_v50 = vpop.f32.mrb[13].mxu0 }
 0x2b0   : > { %v762_v51 = vpop.f32.mrb[14].mxu0 }
 0x2b1   : > { %v1186_v52 = vpop.f32.mrb[15].mxu0  ;;  %v765_v53 = vsel %vm485_vm4, %v760_v49, -inf }
 0x2b2   : > { %766 = vmax.xlane.f32.xlu0 %v765_v53 }
 0x2b6   : > { %v872_v54 = vpop.f32.mrb[16].mxu0 }
 0x2b7   : > { %v873_v55 = vadd.f32 %v1104_v35, %v872_v54  ;;  %v1197_v56 = vpop.f32.mrb[17].mxu0 }
 0x2b8   : > { %v875_v57 = vpop.f32.mrb[18].mxu0 }
 0x2b9   : > { %v1198_v58 = vpop.f32.mrb[19].mxu0  ;;  %v878_v59 = vsel %vm485_vm4, %v873_v55, -inf }
 0x2ba   : > { %879 = vmax.xlane.f32.xlu0 %v878_v59 }
 0x2c2   : > { %v534_v60 = vpop.xlane.xlu0 %533 }
 0x2c3   : > { %v535_v61 = vsub.f32 %v527_v37, %v534_v60 }
 0x2c5   : > { %v536_v62 = vpack.c.bf16 %v535_v61, %v535_v61 }
 0x2c7   : > { %v538_v63 = vmul.bf16 1069105081, %v536_v62 }
 0x2c9   : > { %1308 = vpow.bf16 %v538_v63 }
 0x2d4   : > { %v1309_v1 = vpop.eup %1308 }
 0x2d5   : > { %v540_v2 = vunpack.c.l.bf16 %v1309_v1 }
 0x2d7   : > { %v541_v3 = vsel %vm485_vm4, %v540_v2, 0.0 }
 0x2d8   : > { %542 = vadd.xlane.f32.xlu1 %v541_v3 }
 0x2e9   : > { %550 = vrot.lane.b32.xlu1 %v1771_v23, %s1508_s10  ;;  %s1410_s10 = scalar_lea.vmem %s1834_s19, 128 }
 0x2ea   : > { %p1411_p2 = scmp.ne.s32.totalorder %s1834_s19, %s1410_s10 }
 0x2ec   : > { %p1412_p10 = pnand %p1411_p2, %p1905_p1 }
 0x2ee   : > { %p1413_p3 = pneg %p1412_p10 }
 0x337   : > { %v654_v4 = vpop.xlane.xlu1 %653 }
 0x338   : > { %v655_v5 = vsub.f32 %v647_v43, %v654_v4 }
 0x33a   : > { %v656_v6 = vpack.c.bf16 %v655_v5, %v655_v5 }
 0x33c   : > { %v658_v7 = vmul.bf16 1069105081, %v656_v6 }
 0x33e   : > { %1310 = vpow.bf16 %v658_v7 }
 0x33f   : > { %v767_v8 = vpop.xlane.xlu0 %766 }
 0x340   : > { %v768_v9 = vsub.f32 %v760_v49, %v767_v8 }
 0x342   : > { %v769_v10 = vpack.c.bf16 %v768_v9, %v768_v9 }
 0x344   : > { %v771_v11 = vmul.bf16 1069105081, %v769_v10 }
 0x346   : > { %1312 = vpow.bf16 %v771_v11 }
 0x347   : > { %v880_v12 = vpop.xlane.xlu0 %879 }
 0x348   : > { %v881_v13 = vsub.f32 %v873_v55, %v880_v12 }
 0x349   : > { %v1311_v14 = vpop.eup %1310 }
 0x34a   : > { %v882_v15 = vpack.c.bf16 %v881_v13, %v881_v13  ;;  %v660_v16 = vunpack.c.l.bf16 %v1311_v14 }
 0x34c   : > { %v884_v17 = vmul.bf16 1069105081, %v882_v15  ;;  %v661_v18 = vsel %vm485_vm4, %v660_v16, 0.0 }
 0x34d   : > { %662 = vadd.xlane.f32.xlu0 %v661_v18 }
 0x34e   : > { %1314 = vpow.bf16 %v884_v17 }
 0x351   : > { %v1313_v19 = vpop.eup %1312 }
 0x352   : > { %v773_v20 = vunpack.c.l.bf16 %v1313_v19 }
 0x354   : > { %v774_v21 = vsel %vm485_vm4, %v773_v20, 0.0 }
 0x355   : > { %775 = vadd.xlane.f32.xlu1 %v774_v21 }
 0x359   : > { %v1315_v22 = vpop.eup %1314 }
 0x35a   : > { %v886_v24 = vunpack.c.l.bf16 %v1315_v22 }
 0x35c   : > { %v887_v25 = vsel %vm485_vm4, %v886_v24, 0.0 }
 0x35d   : > { %888 = vadd.xlane.f32.xlu0 %v887_v25 }
 0x365   : > { %v543_v26 = vpop.xlane.xlu1 %542 }
 0x366   : > { %1316 = vrcp.f32 %v543_v26  ;;  %780 = vrot.lane.b32.xlu1 %v1771_v23, %s1509_s20  ;;  %s1515_s20 = smov [#allocation10]  }
 0x369   : > { %v551_v27 = vpop.permute.xlu1 %550 }
 0x36a   : > { %v557_v28 = vsel %vm555_vm5, %v551_v27, 0  ;;  %893 = vrot.lane.b32.xlu1 %v1771_v23, %s1510_s27  ;;  %s1414_s27 = sshll.u32 %s1515_s20, 4  ;;  %s1415_s27 = int_to_ptr.vmem [resolvable:$false] %s1414_s27 }
 0x36b   : > { %1164 = vmatpush3.bf16.msra.mxu1 %v557_v28  ;;  %p1417_p5 = scmp.lt.s32.totalorder %s1834_s19, %s1415_s27 }
 0x36c   : > { %1175 = vmatprep.subr.bf16.mxu1 %v1503_v0 }
 0x370   : > { %v1317_v29 = vpop.eup %1316 }
 0x371   : > { %v545_v30 = vpack.c.bf16 %v1317_v29, %v1317_v29 }
 0x373   : > { %v546_v31 = vmul.bf16 %v1309_v1, %v545_v30  ;;  %667 = vrot.lane.b32.xlu0 %v1771_v23, %s1511_s29  ;;  %s1416_s29 = scalar_lea.vmem %s1415_s27, 256 }
 0x374   : > { %p1418_p9 = scmp.lt.s32.totalorder %s1416_s29, %s1410_s10 }
 0x375   : > { %1166 = vmatmul.mubr.msk.bf16.vlgmr.msra.gmra.mrb[4].mxu1 %vm485_vm4, %v546_v31 }
 0x376   : > { %1177 = vmatprep.mubr.msk.bf16.mxu1 %vm1504_vm0, %v1503_v0  ;;  %p1419_p11 = por %p1418_p9, %p1417_p5 }
 0x378   : > { %p1420_p0 = pnand %p1419_p11, %p1413_p3 }
 0x3da   : > { %v663_v32 = vpop.xlane.xlu0 %662 }
 0x3db   : > { %1318 = vrcp.f32 %v663_v32 }
 0x3e2   : > { %v776_v33 = vpop.xlane.xlu1 %775 }
 0x3e3   : > { %1320 = vrcp.f32 %v776_v33 }
 0x3e5   : > { %v1319_v34 = vpop.eup %1318 }
 0x3e6   : > { %v665_v36 = vpack.c.bf16 %v1319_v34, %v1319_v34  ;;  %v781_v39 = vpop.permute.xlu1 %780 }
 0x3e7   : > { %v786_v41 = vsel %vm555_vm5, %v781_v39, 0 }
 0x3e8   : > { %v666_v40 = vmul.bf16 %v1311_v14, %v665_v36 }
 0x3ea   : > { %v889_v35 = vpop.xlane.xlu0 %888  ;;  %v894_v43 = vpop.permute.xlu1 %893 }
 0x3eb   : > { %1322 = vrcp.f32 %v889_v35  ;;  %v899_v46 = vsel %vm555_vm5, %v894_v43, 0 }
 0x3ed   : > { %v1321_v23 = vpop.eup %1320 }
 0x3ee   : > { %v668_v37 = vpop.permute.xlu0 %667  ;;  %v778_v42 = vpack.c.bf16 %v1321_v23, %v1321_v23 }
 0x3ef   : > { %v673_v38 = vsel %vm555_vm5, %v668_v37, 0 }
 0x3f0   : > { %1176 = vmatpush3.bf16.msra.mxu1 %v673_v38  ;;  %v779_v44 = vmul.bf16 %v1313_v19, %v778_v42 }
 0x3f1   : > { %1187 = vmatprep.subr.bf16.mxu1 %v1503_v0 }
 0x3f3   : > { %1178 = vmatmul.mubr.msk.bf16.vlgmr.msra.gmra.mrb[8].mxu1 %vm485_vm4, %v666_v40 }
 0x3f4   : > { %1188 = vmatpush3.bf16.msra.mxu1 %v786_v41  ;;  %1189 = vmatprep.mubr.msk.bf16.mxu1 %vm1504_vm0, %v1503_v0 }
 0x3f5   : > { %1199 = vmatprep.subr.bf16.mxu1 %v1503_v0  ;;  %v1323_v45 = vpop.eup %1322 }
 0x3f6   : > { %v891_v47 = vpack.c.bf16 %v1323_v45, %v1323_v45 }
 0x3f8   : > { %v892_v48 = vmul.bf16 %v1315_v22, %v891_v47 }
 0x3fb   : > { %1190 = vmatmul.mubr.msk.bf16.vlgmr.msra.gmra.mrb[12].mxu1 %vm485_vm4, %v779_v44 }
 0x3fc   : > { %1200 = vmatpush3.bf16.msra.mxu1 %v899_v46  ;;  %1201 = vmatprep.mubr.msk.bf16.mxu1 %vm1504_vm0, %v1503_v0 }
 0x403   : > { %1202 = vmatmul.mubr.msk.bf16.vlgmr.msra.gmra.mrb[16].mxu1 %vm485_vm4, %v892_v48 }
 0x448   : > { %v593_v49 = vpop.f32.mrb[4].mxu1 }
 0x449   : > { %v1167_v50 = vpop.f32.mrb[5].mxu1 }
 0x44a   : > { %v596_v51 = vpop.f32.mrb[6].mxu1 }
 0x44b   : > { %v1168_v52 = vpop.f32.mrb[7].mxu1 }
 0x4c6   : > { %v709_v53 = vpop.f32.mrb[8].mxu1 }
 0x4c7   : > { %942 = vrot.lane.b32.xlu0 %v709_v53, %s1512_s7  ;;  %v1179_v54 = vpop.f32.mrb[9].mxu1 }
 0x4c8   : > { %v712_v55 = vpop.f32.mrb[10].mxu1 }
 0x4c9   : > { %v1180_v56 = vpop.f32.mrb[11].mxu1 }
 0x4ce   : > { %v822_v57 = vpop.f32.mrb[12].mxu1 }
 0x4cf   : > { %946 = vrot.lane.b32.xlu1 %v822_v57, %s1513_s9  ;;  %v1191_v0 = vpop.f32.mrb[13].mxu1 }
 0x4d0   : > { %v825_v58 = vpop.f32.mrb[14].mxu1 }
 0x4d1   : > { %v1192_v59 = vpop.f32.mrb[15].mxu1 }
 0x4d6   : > { %v935_v60 = vpop.f32.mrb[16].mxu1 }
 0x4d7   : > { %950 = vrot.lane.b32.xlu0 %v935_v60, %s1514_s28  ;;  %v1203_v61 = vpop.f32.mrb[17].mxu1 }
 0x4d8   : > { %v938_v62 = vpop.f32.mrb[18].mxu1 }
 0x4d9   : > { %v1204_v63 = vpop.f32.mrb[19].mxu1 }
 0x539   : > { %v943_v1 = vpop.permute.xlu0 %942 }
 0x53a   : > { %v953_v3 = vsel %vm485_vm4, %v593_v49, %v943_v1 }
 0x541   : > { %v947_v2 = vpop.permute.xlu1 %946 }
 0x542   : > { %v955_v4 = vsel %vm954_vm6, %v953_v3, %v947_v2 }
 0x549   : > { %v951_v5 = vpop.permute.xlu0 %950 }
 0x54a   : > { %v957_v6 = vsel %vm956_vm7, %v955_v4, %v951_v5 }
 0x54b   : > { %958 = vst.msk [vmem:[%s320_s15] sm:$0xff] %vm353_vm1, %v957_v6 }
 0x54c   : > { %1423 = shalt.err (!%p1420_p0)
}
 0x54d   : > { %s1424_s17 = scalar_lea.hbm %s1832_s14, 128  ;;  %s1428_s28 = scalar_lea.hbm %s1888_s6, 256 }
 0x54e   : > { %p1425_p4 = scmp.ne.s32.totalorder %s1832_s14, %s1424_s17  ;;  %p1429_p7 = scmp.lt.u32.totalorder %s1832_s14, %s1888_s6 }
 0x54f   : > { %p1430_p12 = scmp.lt.u32.totalorder %s1428_s28, %s1424_s17  ;;  %p1432_p2 = scmp.lt.u32.totalorder %s1424_s17, %s1832_s14 }
 0x550   : > { %p1426_p13 = pnand %p1425_p4, %p1905_p1 }
 0x551   : > { %p1431_p8 = por %p1430_p12, %p1429_p7 }
 0x552   : > { %p1427_p6 = pneg %p1426_p13 }
 0x553   : > { %p1433_p10 = por %p1432_p2, %p1431_p8 }
 0x555   : > { %p1434_p3 = pnand %p1433_p10, %p1427_p6 }
 0x557   : > { %1437 = shalt.err (!%p1434_p3)
}
 0x558   : > { %1215 = dma.vmem_to_hbm [thread:$0]  (%p1905_p1), %s1834_s19, 128, %s1832_s14, %s960_s24  }
 0x559 PF: > { %s1906_s15 = sld [smem:[#allocation14_spill]]  ;;  %s986_s30 = sand.u32 1, %s1476_s21  }
 0x55a   : > { %p1908_p9 = scmp.ge.s32.totalorder %s1496_s26, 2  ;;  %s987_s18 = scalar_lea.sflag [#allocation6], %s986_s30 }
 0x55f   : > { %p1907_p5 = scmp.ne.s32.totalorder %s1906_s15, 0 }
 0x561   : > { %p1229_p11 = pnand %p1908_p9, %p1907_p5 }
 0x563   : > { %1471 = dma.done.wait (!%p1229_p11), %s987_s18, 128  }
 0x564   : > { %1473 = vsyncadd (!%p1229_p11), %s987_s18, 4294967168  ;;  %s23_s26 = sadd.s32 1, %s1496_s26   ;;  %s1909_s21 = smov %s1480_s22 }
 0x565   : > { %p20_p0 = scmp.ge.s32.totalorder %s23_s26, 4   ;;  %s1910_s22 = smov %s1484_s23 }
 0x566   : > { %s1911_s23 = smov %s1693_s13  ;;  %s1912_s24 = smov %s1492_s25 }
 0x567   : > { %s1913_s25 = smov %s1915_s16  ;;  %22 = sbr.rel (!%p20_p0) target bundleno = 7 (0x7), region = 105 }
 0x56e   :  { %992 = vsyncpa [#allocation5], 1 }
 0x56f   :  { %994 = vsyncpa [#allocation5 + $0x1], 1 }
 0x570   :  { %995 = vsyncpa [#allocation8], 1 }
 0x571   :  { %996 = vsyncpa [#allocation6], 1 }
 0x572   :  { %998 = vsyncpa [#allocation6 + $0x1], 1 }

</bundles_post_ra>
